<compile_context>
chip_gen: v7x
topology: tpu7x:2x2x1
jax: 0.10.0
libtpu: 0.0.40
codegen_flags: <defaults>
</compile_context>

<pallas_src>
import functools
import math

import jax
import jax.numpy as jnp
from jax.experimental import pallas as pl
from jax.experimental.pallas import tpu as pltpu


def _round_up(v: int, mult: int) -> int:
    return ((v + mult - 1) // mult) * mult


def _pack_factor(f: int) -> int:
    # Fold `pack` batch rows into one 128-lane row when F divides 128.
    if f < 128 and 128 % f == 0:
        return 128 // f
    return 1


def _sublane(dtype) -> int:
    itemsize = jnp.dtype(dtype).itemsize
    return 8 if itemsize >= 4 else (16 if itemsize == 2 else 32)


def _coxph_kernel(x_ref, w_ref, b_ref, o_ref):
    # x_ref: (tm, lanes)   VMEM  lane-dense packed input rows
    # w_ref: (lanes, pack) VMEM  block-diagonal weight (constant across grid)
    # b_ref: (1, 1)        SMEM  scalar bias
    # o_ref: (tm, pack)    VMEM  packed logits (f32)
    o_ref[...] = (
        jnp.dot(x_ref[...], w_ref[...], preferred_element_type=jnp.float32)
        + b_ref[0, 0]
    ).astype(o_ref.dtype)


def coxph_pack_weight(weight, in_features: int, dtype):
    """Build the (lanes, pack) block-diagonal weight = kron(I_pack, w).

    Tiny (<= 128x128); build once outside a training loop and reuse.
    Off-diagonal zeros contribute exact zeros, so numerics match x @ W^T.
    """
    pack = _pack_factor(in_features)
    w_vec = weight.reshape(in_features).astype(dtype)
    w_block = jnp.kron(jnp.eye(pack, dtype=dtype), w_vec.reshape(in_features, 1))
    return w_block, pack


def _call_kernel(x_packed, w_block, b2d, tile_m: int):
    m, lanes = x_packed.shape
    pack = w_block.shape[1]
    itemsize = jnp.dtype(x_packed.dtype).itemsize
    sub = _sublane(x_packed.dtype)

    # Tile choice: big tiles amortise the per-grid-step overhead; keep the grid
    # >= 2 for moderately large inputs so v7x's two TensorCores both get work.
    if m > tile_m:
        tm = _round_up(min(tile_m, m), sub)
    elif m >= 2048:
        tm = _round_up(pl.cdiv(m, 2), sub)
    else:
        tm = m  # single block == full dim (always a legal block shape)
    grid = (pl.cdiv(m, tm),)

    # VMEM budget: double-buffered input + double-buffered output (the narrow
    # (tm, pack) block is lane-padded to 128 in VMEM) + weight + slack.
    in_tile = tm * lanes * itemsize
    out_tile = tm * 128 * 4
    vmem_limit = 2 * (in_tile + out_tile) + lanes * 128 * itemsize + (2 << 20)
    vmem_limit = max(int(vmem_limit), 16 << 20)

    cost = pl.CostEstimate(
        flops=2 * m * lanes * pack,
        transcendentals=0,
        bytes_accessed=m * lanes * itemsize + m * pack * 4 + lanes * pack * itemsize,
    )

    return pl.pallas_call(
        _coxph_kernel,
        out_shape=jax.ShapeDtypeStruct((m, pack), jnp.float32),
        grid_spec=pltpu.PrefetchScalarGridSpec(
            num_scalar_prefetch=0,
            grid=grid,
            in_specs=[
                pl.BlockSpec((tm, lanes), lambda i: (i, 0)),
                pl.BlockSpec((lanes, pack), lambda i: (0, 0)),
                pl.BlockSpec(memory_space=pltpu.SMEM),
            ],
            out_specs=pl.BlockSpec((tm, pack), lambda i: (i, 0)),
        ),
        compiler_params=pltpu.CompilerParams(
            dimension_semantics=("parallel",),
            vmem_limit_bytes=vmem_limit,
        ),
        cost_estimate=cost,
    )(x_packed, w_block, b2d)


@functools.partial(jax.jit, static_argnames=("tile_m",))
def coxph_forward_packed(x_packed, w_block, bias, *, tile_m=8192):
    """Hot path for producers that already emit packed (m, pack*F) activations.

    Returns packed logits of shape (m, pack); row-major flatten gives the
    per-row logits.
    """
    b2d = bias.reshape(1, 1).astype(jnp.float32)
    return _call_kernel(x_packed, w_block, b2d, tile_m)


@functools.partial(jax.jit, static_argnames=("tile_m",))
def coxph_forward(x, weight, bias, *, tile_m=8192):
    """Pallas equivalent of CoxPH.forward: outputs = self.l1(x).

    x:      (N, F)
    weight: (1, F)  (PyTorch nn.Linear weight layout)
    bias:   (1,)
    returns (N, 1) float32
    """
    n, f = x.shape
    pack = _pack_factor(f)
    lanes = pack * f

    # Pad the batch so rows pack evenly into 128-lane rows.  Under jit the
    # pad + packing reshape fuse into one relayout pass over x; producers that
    # can emit packed activations should call coxph_forward_packed instead.
    n_pad = _round_up(n, pack)
    xp = x if n_pad == n else jnp.pad(x, ((0, n_pad - n), (0, 0)))
    x_packed = xp.reshape(n_pad // pack, lanes)

    w_block, _ = coxph_pack_weight(weight, f, x.dtype)
    b2d = bias.reshape(1, 1).astype(jnp.float32)

    out_packed = _call_kernel(x_packed, w_block, b2d, tile_m)
    # (m, pack) -> (n_pad, 1), then drop pack-padding rows.
    return out_packed.reshape(n_pad, 1)[:n]


if __name__ == "__main__":
    key = jax.random.PRNGKey(0)
    batch = 8
    in_features = 32

    k_x, k_w, k_b, k_x2, k_x3 = jax.random.split(key, 5)
    x = jax.random.normal(k_x, (batch, in_features), dtype=jnp.float32)

    # Deterministic parameter init mirroring nn.Linear.reset_parameters:
    # uniform(-1/sqrt(in_features), 1/sqrt(in_features))
    bound = 1.0 / math.sqrt(in_features)
    weight = jax.random.uniform(
        k_w, (1, in_features), minval=-bound, maxval=bound, dtype=jnp.float32)
    bias = jax.random.uniform(
        k_b, (1,), minval=-bound, maxval=bound, dtype=jnp.float32)

    # Small-shape check (matches the module's forward at batch=8).
    out = jax.block_until_ready(coxph_forward(x, weight, bias))
    ref = x @ weight.T + bias
    assert out.shape == (batch, 1), out.shape
    assert jnp.allclose(out, ref, atol=1e-5)

    # Multi-tile grid, partial last tile, and pack-padding path
    # (1030 rows, pack=4 -> 1032 padded, 258 packed rows, 5 grid steps).
    n2 = 1030
    x2 = jax.random.normal(k_x2, (n2, in_features), dtype=jnp.float32)
    out2 = jax.block_until_ready(coxph_forward(x2, weight, bias, tile_m=64))
    ref2 = x2 @ weight.T + bias
    assert out2.shape == (n2, 1), out2.shape
    assert jnp.allclose(out2, ref2, atol=1e-5)

    # Default-tile path exercising the two-TensorCore split (m >= 2048 packed
    # rows -> grid of 2) plus pack padding (16402 % 4 != 0).
    n3 = 16402
    x3 = jax.random.normal(k_x3, (n3, in_features), dtype=jnp.float32)
    out3 = jax.block_until_ready(coxph_forward(x3, weight, bias))
    ref3 = x3 @ weight.T + bias
    assert out3.shape == (n3, 1), out3.shape
    assert jnp.allclose(out3, ref3, atol=1e-5)

    # TODO(synk): calculate_baseline_survival / Breslow estimator is a
    # data-dependent sequential scan over sorted event times (training-time
    # statistic, not part of forward); left out of the kernel.
    print("KERNEL_OK")
</pallas_src>

<mosaic_0001>
module attributes {stable_mosaic.version = 11 : i64} {
  func.func @_coxph_kernel(%arg0: i32, %arg1: memref<2x128xf32, #tpu.memory_space<vmem>>, %arg2: memref<128x4xf32, #tpu.memory_space<vmem>>, %arg3: memref<1x1xf32, #tpu.memory_space<smem>>, %arg4: memref<2x4xf32, #tpu.memory_space<vmem>>) attributes {dimension_semantics = [#tpu.dimension_semantics<parallel>], iteration_bounds = array<i64: 1>, scalar_prefetch = 0 : i64, scratch_operands = 0 : i64, tpu.core_type = #tpu.core_type<tc>, window_params = [{transform_indices = @transform_0, window_bounds = array<i64: 2, 128>}, {pipeline_mode = #tpu.pipeline_mode<synchronous>, transform_indices = @transform_1, window_bounds = array<i64: 128, 4>}, {transform_indices = @transform_2, window_bounds = array<i64: 1, 1>}, {transform_indices = @transform_3, window_bounds = array<i64: 2, 4>}]} {
    %c0 = arith.constant 0 : index
    %c0_0 = arith.constant 0 : index
    %0 = vector.load %arg1[%c0, %c0_0] : memref<2x128xf32, #tpu.memory_space<vmem>>, vector<2x128xf32>
    %c0_1 = arith.constant 0 : index
    %c0_2 = arith.constant 0 : index
    %1 = vector.load %arg2[%c0_1, %c0_2] : memref<128x4xf32, #tpu.memory_space<vmem>>, vector<128x4xf32>
    %cst = arith.constant dense<0.000000e+00> : vector<2x4xf32>
    %2 = tpu.matmul %0, %1, %cst {dimension_numbers = #tpu.dot_dimension_numbers<[1], [0], [0], [1], [0, 0, 1, 1], [], []>} : vector<2x128xf32>, vector<128x4xf32>, vector<2x4xf32> -> vector<2x4xf32>
    %c0_3 = arith.constant 0 : index
    %c0_4 = arith.constant 0 : index
    %3 = memref.load %arg3[%c0_3, %c0_4] : memref<1x1xf32, #tpu.memory_space<smem>>
    %4 = vector.broadcast %3 : f32 to vector<2x4xf32>
    %5 = arith.addf %2, %4 : vector<2x4xf32>
    %c0_5 = arith.constant 0 : index
    %c0_6 = arith.constant 0 : index
    %6 = vector.load %arg4[%c0_5, %c0_6] : memref<2x4xf32, #tpu.memory_space<vmem>>, vector<2x4xf32>
    tpu.vector_store %arg4[%c0_5, %c0_6], %5 {strides = array<i32>} : memref<2x4xf32, #tpu.memory_space<vmem>>, vector<2x4xf32>,
    return
  }
  func.func @transform_0(%arg0: i32) -> (i32, i32) {
    %c0_i32 = arith.constant 0 : i32
    %c0_i32_0 = arith.constant 0 : i32
    return %arg0, %c0_i32 : i32, i32
  }
  func.func @transform_1(%arg0: i32) -> (i32, i32) {
    %c0_i32 = arith.constant 0 : i32
    %c0_i32_0 = arith.constant 0 : i32
    %c0_i32_1 = arith.constant 0 : i32
    return %c0_i32, %c0_i32_0 : i32, i32
  }
  func.func @transform_2(%arg0: i32) -> (i32, i32) {
    %c0_i32 = arith.constant 0 : i32
    %c0_i32_0 = arith.constant 0 : i32
    %c0_i32_1 = arith.constant 0 : i32
    return %c0_i32, %c0_i32_0 : i32, i32
  }
  func.func @transform_3(%arg0: i32) -> (i32, i32) {
    %c0_i32 = arith.constant 0 : i32
    %c0_i32_0 = arith.constant 0 : i32
    return %arg0, %c0_i32 : i32, i32
  }
}

</mosaic_0001>

<bundles_post_ra>
// kernel: coxph_forward.1
= control target key start
LH: loop header
LB: loop body
LE: loop exit
PB: predicated region body
PF: predicated region fallthrough
CT: control target
= control target key end

     0   :  { %v189_v0 = vmov 0.0|0.0   ;;  %vm190_vm0 = vmmov 0   ;;  %v191_v4 = vmov 0.0   ;;  %vm104_vm1 = vcmask 25600   ;;  %s269_s1 = inlined_call_operand.vmem [shape: f32[128,4], index: 1, kind: input, shape index: {}]   ;;  %s270_s0 = inlined_call_operand.vmem [shape: f32[2,128], index: 0, kind: input, shape index: {}]   ;;  %s271_s2 = inlined_call_operand.<no memory space> [shape: f32[1,1], index: 2, kind: input, shape index: {}]   ;;  %s272_s3 = inlined_call_operand.vmem [shape: f32[2,4], index: 3, kind: output, shape index: {}]  }
   0x1   :  { %162 = vmatprep.subr.bf16.mxu0 %v189_v0  ;;  %v16_v1 = vld [vmem:[%s269_s1] sm:$0xff]  ;;  %v17_v2 = vld [vmem:[%s269_s1 + $0x8] sm:$0xff]  ;;  %v18_v3 = vld [vmem:[%s269_s1 + $0x10] sm:$0xff]  ;;  %159 = vmatprep.mubr.msk.f32.mxu0 %vm190_vm0, %v191_v4  ;;  %v33_v27 = vstv %s271_s2 }
   0x2   :  { %v163_v5 = vpack.c.bf16 %v17_v2, %v16_v1  ;;  %v19_v6 = vld [vmem:[%s269_s1 + $0x18] sm:$0xff]  ;;  %v20_v8 = vld [vmem:[%s269_s1 + $0x20] sm:$0xff]  ;;  %v21_v9 = vld [vmem:[%s269_s1 + $0x28] sm:$0xff] }
   0x3   :  { %v166_v7 = vpack.c.bf16 %v19_v6, %v18_v3  ;;  %v169_v10 = vpack.c.bf16 %v21_v9, %v20_v8  ;;  %v22_v11 = vld [vmem:[%s269_s1 + $0x30] sm:$0xff]  ;;  %v23_v12 = vld [vmem:[%s269_s1 + $0x38] sm:$0xff]  ;;  %v24_v14 = vld [vmem:[%s269_s1 + $0x40] sm:$0xff] }
   0x4   :  { %164 = vmatpush3.bf16.msra.mxu0 %v163_v5  ;;  %v172_v13 = vpack.c.bf16 %v23_v12, %v22_v11  ;;  %v25_v15 = vld [vmem:[%s269_s1 + $0x48] sm:$0xff]  ;;  %v26_v17 = vld [vmem:[%s269_s1 + $0x50] sm:$0xff]  ;;  %v27_v18 = vld [vmem:[%s269_s1 + $0x58] sm:$0xff] }
   0x5   :  { %165 = vmatprep.subr.bf16.mxu0 %v189_v0  ;;  %v175_v16 = vpack.c.bf16 %v25_v15, %v24_v14  ;;  %v178_v19 = vpack.c.bf16 %v27_v18, %v26_v17  ;;  %v28_v20 = vld [vmem:[%s269_s1 + $0x60] sm:$0xff]  ;;  %v29_v21 = vld [vmem:[%s269_s1 + $0x68] sm:$0xff]  ;;  %v30_v23 = vld [vmem:[%s269_s1 + $0x70] sm:$0xff] }
   0x6   :  { %v181_v22 = vpack.c.bf16 %v29_v21, %v28_v20  ;;  %v31_v24 = vld [vmem:[%s269_s1 + $0x78] sm:$0xff]  ;;  %v15_v26 = vld [vmem:[%s270_s0] sm:$0x3] }
   0x7   :  { %v184_v25 = vpack.c.bf16 %v31_v24, %v30_v23 }
   0x8   :  { %167 = vmatpush3.bf16.msra.mxu0 %v166_v7 }
   0x9   :  { %168 = vmatprep.subr.bf16.mxu0 %v189_v0 }
   0xc   :  { %170 = vmatpush3.bf16.msra.mxu0 %v169_v10 }
   0xd   :  { %171 = vmatprep.subr.bf16.mxu0 %v189_v0 }
  0x10   :  { %173 = vmatpush3.bf16.msra.mxu0 %v172_v13 }
  0x11   :  { %174 = vmatprep.subr.bf16.mxu0 %v189_v0 }
  0x14   :  { %176 = vmatpush3.bf16.msra.mxu0 %v175_v16 }
  0x15   :  { %177 = vmatprep.subr.bf16.mxu0 %v189_v0 }
  0x18   :  { %179 = vmatpush3.bf16.msra.mxu0 %v178_v19 }
  0x19   :  { %180 = vmatprep.subr.bf16.mxu0 %v189_v0 }
  0x1c   :  { %182 = vmatpush3.bf16.msra.mxu0 %v181_v22 }
  0x1d   :  { %183 = vmatprep.subr.bf16.mxu0 %v189_v0 }
  0x20   :  { %185 = vmatpush3.bf16.msra.mxu0 %v184_v25 }
  0x23   :  { %160 = vmatmul.mubr.f32.vlgmr.msra.gmra.mrb[0].mxu0 %v15_v26 }
  0xf6   :  { %v100_v28 = vpop.f32.mrb[0].mxu0 }
  0xf7   :  { %v101_v29 = vadd.f32 %v100_v28, %v33_v27  ;;  %v161_v30 = vpop.f32.mrb[1].mxu0 }
  0xf9   :  { %105 = vst.msk [vmem:[%s272_s3] sm:$0x3] %vm104_vm1, %v101_v29 }

</bundles_post_ra>
